<compile_context>
chip_gen: v5e
topology: v5e:2x2
jax: 0.10.0
libtpu: 0.0.40
codegen_flags: <defaults>
</compile_context>

<pallas_src>
import jax
import jax.numpy as jnp
import numpy as np
from jax.experimental import pallas as pl
from jax.experimental.pallas import tpu as pltpu

_LANES = 128


def _freq_bands(N_freqs: int, logscale: bool) -> list:
    if logscale:
        bands = 2.0 ** np.linspace(0.0, N_freqs - 1, N_freqs)
    else:
        bands = np.linspace(1.0, 2.0 ** (N_freqs - 1), N_freqs)
    return [float(f) for f in bands]


def _make_embedding_kernel(freqs):
    """Kernel over a lane-dense tile.

    x_ref  : (block_rows, 128)                  -- flattened input elements
    out_ref: (2*N_freqs+1, block_rows, 128)     -- out_ref[0] = x,
                                                   out_ref[1+2i] = sin(f_i*x),
                                                   out_ref[2+2i] = cos(f_i*x)
    Every compute op and every store is a full 128-lane dense vreg op.
    """

    def kernel(x_ref, out_ref):
        x = x_ref[...]
        out_ref[0] = x
        for i, freq in enumerate(freqs):        # static unroll (N_freqs is small)
            xf = freq * x
            out_ref[1 + 2 * i] = jnp.sin(xf)
            out_ref[2 + 2 * i] = jnp.cos(xf)

    return kernel


def embedding_forward(x, N_freqs: int, logscale: bool = True, block_rows: int = 512):
    """Pallas equivalent of Embedding.forward.

    x: (B, in_channels)
    returns: (B, in_channels * (2 * N_freqs + 1)), same dtype as x, with the
             torch.cat column order [x, sin(f0 x), cos(f0 x), sin(f1 x), ...].
    """
    B, C = x.shape
    K = 2 * N_freqs + 1
    freqs = _freq_bands(N_freqs, logscale)

    # --- lane-dense tiling of the flattened input -------------------------
    total = B * C
    rows_needed = -(-total // _LANES)                 # ceil(total / 128)
    rows = ((rows_needed + 7) // 8) * 8               # sublane multiple of 8

    block_rows = max(8, (int(block_rows) // 8) * 8)   # keep (8,128) alignment
    if rows <= block_rows:
        block_rows = rows
        n_blocks = 1
    else:
        n_blocks = -(-rows // block_rows)
        rows = n_blocks * block_rows
    # Double-buffered VMEM footprint per step:
    #   2 * (1 + K) * block_rows * 128 * 4 bytes  (~11.5 MiB for K=21, rows=512)
    # -> comfortably under the 32 MiB default scoped VMEM on v5e/v6e/v7x.

    x_flat = x.reshape(-1)
    pad = rows * _LANES - total
    if pad:
        x_flat = jnp.pad(x_flat, (0, pad))
    x_dense = x_flat.reshape(rows, _LANES)

    kernel = _make_embedding_kernel(freqs)

    out_dense = pl.pallas_call(
        kernel,
        out_shape=jax.ShapeDtypeStruct((K, rows, _LANES), x.dtype),
        grid_spec=pltpu.PrefetchScalarGridSpec(
            num_scalar_prefetch=0,
            grid=(n_blocks,),
            in_specs=[pl.BlockSpec((block_rows, _LANES), lambda i: (i, 0))],
            out_specs=pl.BlockSpec((K, block_rows, _LANES), lambda i: (0, i, 0)),
        ),
        compiler_params=pltpu.CompilerParams(
            # independent tiles -> shard grid steps across TensorCores (v7x megacore)
            dimension_semantics=("parallel",),
        ),
    )(x_dense)

    # --- recover the exact (B, C*(2N+1)) PyTorch layout --------------------
    # out_dense[k, r, l] = func_k(x_flat[r*128 + l]); drop pad, then interleave
    # the function axis between batch and channel. Single XLA reshape/transpose.
    y = out_dense.reshape(K, rows * _LANES)[:, :total]
    y = y.reshape(K, B, C)
    y = jnp.transpose(y, (1, 0, 2)).reshape(B, K * C)
    return y


def embedding_reference(x, N_freqs: int, logscale: bool = True):
    """Pure-JAX reference mirroring the PyTorch forward."""
    outs = [x]
    for freq in _freq_bands(N_freqs, logscale):
        outs.append(jnp.sin(freq * x))
        outs.append(jnp.cos(freq * x))
    return jnp.concatenate(outs, axis=-1)


if __name__ == "__main__":
    key = jax.random.PRNGKey(0)
    k1, k2 = jax.random.split(key)

    # Case 1: typical NeRF direction embedding; B not a multiple of anything
    # special (exercises the padding path).
    B, C, N_freqs = 37, 3, 4              # out_channels = 3 * (2*4 + 1) = 27
    x = jax.random.normal(k1, (B, C), dtype=jnp.float32)
    out = jax.block_until_ready(embedding_forward(x, N_freqs=N_freqs, logscale=True))
    ref = jax.block_until_ready(embedding_reference(x, N_freqs=N_freqs, logscale=True))
    assert out.shape == (B, C * (2 * N_freqs + 1)), out.shape
    assert out.dtype == x.dtype
    # Tolerance relaxed vs 1e-6: TPU sin/cos lowerings may differ slightly
    # between Pallas and the XLA reference (range reduction / polynomial).
    np.testing.assert_allclose(np.asarray(out), np.asarray(ref), rtol=1e-5, atol=1e-4)

    # Case 2: linear frequency bands, multi-tile grid (small block_rows to force
    # several grid steps while keeping shapes tiny).
    B2, C2, N2 = 1000, 3, 6
    x2 = jax.random.normal(k2, (B2, C2), dtype=jnp.float32)
    out2 = jax.block_until_ready(
        embedding_forward(x2, N_freqs=N2, logscale=False, block_rows=8))
    ref2 = jax.block_until_ready(embedding_reference(x2, N_freqs=N2, logscale=False))
    assert out2.shape == (B2, C2 * (2 * N2 + 1)), out2.shape
    np.testing.assert_allclose(np.asarray(out2), np.asarray(ref2), rtol=1e-5, atol=1e-4)

    print("KERNEL_OK")
</pallas_src>

<mosaic_0001>
module attributes {stable_mosaic.version = 11 : i64} {
  func.func @kernel(%arg0: i32, %arg1: memref<8x128xf32, #tpu.memory_space<vmem>>, %arg2: memref<9x8x128xf32, #tpu.memory_space<vmem>>) attributes {dimension_semantics = [#tpu.dimension_semantics<parallel>], iteration_bounds = array<i64: 1>, scalar_prefetch = 0 : i64, scratch_operands = 0 : i64, tpu.core_type = #tpu.core_type<tc>, window_params = [{transform_indices = @transform_0, window_bounds = array<i64: 8, 128>}, {transform_indices = @transform_1, window_bounds = array<i64: 9, 8, 128>}]} {
    %c0 = arith.constant 0 : index
    %c0_0 = arith.constant 0 : index
    %0 = vector.load %arg1[%c0, %c0_0] : memref<8x128xf32, #tpu.memory_space<vmem>>, vector<8x128xf32>
    %c0_1 = arith.constant 0 : index
    %c0_2 = arith.constant 0 : index
    %c0_3 = arith.constant 0 : index
    %1 = vector.load %arg2[%c0_1, %c0_2, %c0_3] : memref<9x8x128xf32, #tpu.memory_space<vmem>>, vector<1x8x128xf32>
    %2 = vector.shape_cast %1 : vector<1x8x128xf32> to vector<8x128xf32>
    %3 = vector.shape_cast %0 : vector<8x128xf32> to vector<1x8x128xf32>
    tpu.vector_store %arg2[%c0_1, %c0_2, %c0_3], %3 {strides = array<i32>} : memref<9x8x128xf32, #tpu.memory_space<vmem>>, vector<1x8x128xf32>,
    %cst = arith.constant 1.000000e+00 : f32
    %4 = vector.broadcast %cst : f32 to vector<8x128xf32>
    %5 = arith.mulf %4, %0 : vector<8x128xf32>
    %6 = math.sin %5 : vector<8x128xf32>
    %c1 = arith.constant 1 : index
    %c0_4 = arith.constant 0 : index
    %c0_5 = arith.constant 0 : index
    %7 = vector.load %arg2[%c1, %c0_4, %c0_5] : memref<9x8x128xf32, #tpu.memory_space<vmem>>, vector<1x8x128xf32>
    %8 = vector.shape_cast %7 : vector<1x8x128xf32> to vector<8x128xf32>
    %9 = vector.shape_cast %6 : vector<8x128xf32> to vector<1x8x128xf32>
    tpu.vector_store %arg2[%c1, %c0_4, %c0_5], %9 {strides = array<i32>} : memref<9x8x128xf32, #tpu.memory_space<vmem>>, vector<1x8x128xf32>,
    %10 = math.cos %5 : vector<8x128xf32>
    %c2 = arith.constant 2 : index
    %c0_6 = arith.constant 0 : index
    %c0_7 = arith.constant 0 : index
    %11 = vector.load %arg2[%c2, %c0_6, %c0_7] : memref<9x8x128xf32, #tpu.memory_space<vmem>>, vector<1x8x128xf32>
    %12 = vector.shape_cast %11 : vector<1x8x128xf32> to vector<8x128xf32>
    %13 = vector.shape_cast %10 : vector<8x128xf32> to vector<1x8x128xf32>
    tpu.vector_store %arg2[%c2, %c0_6, %c0_7], %13 {strides = array<i32>} : memref<9x8x128xf32, #tpu.memory_space<vmem>>, vector<1x8x128xf32>,
    %cst_8 = arith.constant 2.000000e+00 : f32
    %14 = vector.broadcast %cst_8 : f32 to vector<8x128xf32>
    %15 = arith.mulf %14, %0 : vector<8x128xf32>
    %16 = math.sin %15 : vector<8x128xf32>
    %c3 = arith.constant 3 : index
    %c0_9 = arith.constant 0 : index
    %c0_10 = arith.constant 0 : index
    %17 = vector.load %arg2[%c3, %c0_9, %c0_10] : memref<9x8x128xf32, #tpu.memory_space<vmem>>, vector<1x8x128xf32>
    %18 = vector.shape_cast %17 : vector<1x8x128xf32> to vector<8x128xf32>
    %19 = vector.shape_cast %16 : vector<8x128xf32> to vector<1x8x128xf32>
    tpu.vector_store %arg2[%c3, %c0_9, %c0_10], %19 {strides = array<i32>} : memref<9x8x128xf32, #tpu.memory_space<vmem>>, vector<1x8x128xf32>,
    %20 = math.cos %15 : vector<8x128xf32>
    %c4 = arith.constant 4 : index
    %c0_11 = arith.constant 0 : index
    %c0_12 = arith.constant 0 : index
    %21 = vector.load %arg2[%c4, %c0_11, %c0_12] : memref<9x8x128xf32, #tpu.memory_space<vmem>>, vector<1x8x128xf32>
    %22 = vector.shape_cast %21 : vector<1x8x128xf32> to vector<8x128xf32>
    %23 = vector.shape_cast %20 : vector<8x128xf32> to vector<1x8x128xf32>
    tpu.vector_store %arg2[%c4, %c0_11, %c0_12], %23 {strides = array<i32>} : memref<9x8x128xf32, #tpu.memory_space<vmem>>, vector<1x8x128xf32>,
    %cst_13 = arith.constant 4.000000e+00 : f32
    %24 = vector.broadcast %cst_13 : f32 to vector<8x128xf32>
    %25 = arith.mulf %24, %0 : vector<8x128xf32>
    %26 = math.sin %25 : vector<8x128xf32>
    %c5 = arith.constant 5 : index
    %c0_14 = arith.constant 0 : index
    %c0_15 = arith.constant 0 : index
    %27 = vector.load %arg2[%c5, %c0_14, %c0_15] : memref<9x8x128xf32, #tpu.memory_space<vmem>>, vector<1x8x128xf32>
    %28 = vector.shape_cast %27 : vector<1x8x128xf32> to vector<8x128xf32>
    %29 = vector.shape_cast %26 : vector<8x128xf32> to vector<1x8x128xf32>
    tpu.vector_store %arg2[%c5, %c0_14, %c0_15], %29 {strides = array<i32>} : memref<9x8x128xf32, #tpu.memory_space<vmem>>, vector<1x8x128xf32>,
    %30 = math.cos %25 : vector<8x128xf32>
    %c6 = arith.constant 6 : index
    %c0_16 = arith.constant 0 : index
    %c0_17 = arith.constant 0 : index
    %31 = vector.load %arg2[%c6, %c0_16, %c0_17] : memref<9x8x128xf32, #tpu.memory_space<vmem>>, vector<1x8x128xf32>
    %32 = vector.shape_cast %31 : vector<1x8x128xf32> to vector<8x128xf32>
    %33 = vector.shape_cast %30 : vector<8x128xf32> to vector<1x8x128xf32>
    tpu.vector_store %arg2[%c6, %c0_16, %c0_17], %33 {strides = array<i32>} : memref<9x8x128xf32, #tpu.memory_space<vmem>>, vector<1x8x128xf32>,
    %cst_18 = arith.constant 8.000000e+00 : f32
    %34 = vector.broadcast %cst_18 : f32 to vector<8x128xf32>
    %35 = arith.mulf %34, %0 : vector<8x128xf32>
    %36 = math.sin %35 : vector<8x128xf32>
    %c7 = arith.constant 7 : index
    %c0_19 = arith.constant 0 : index
    %c0_20 = arith.constant 0 : index
    %37 = vector.load %arg2[%c7, %c0_19, %c0_20] : memref<9x8x128xf32, #tpu.memory_space<vmem>>, vector<1x8x128xf32>
    %38 = vector.shape_cast %37 : vector<1x8x128xf32> to vector<8x128xf32>
    %39 = vector.shape_cast %36 : vector<8x128xf32> to vector<1x8x128xf32>
    tpu.vector_store %arg2[%c7, %c0_19, %c0_20], %39 {strides = array<i32>} : memref<9x8x128xf32, #tpu.memory_space<vmem>>, vector<1x8x128xf32>,
    %40 = math.cos %35 : vector<8x128xf32>
    %c8 = arith.constant 8 : index
    %c0_21 = arith.constant 0 : index
    %c0_22 = arith.constant 0 : index
    %41 = vector.load %arg2[%c8, %c0_21, %c0_22] : memref<9x8x128xf32, #tpu.memory_space<vmem>>, vector<1x8x128xf32>
    %42 = vector.shape_cast %41 : vector<1x8x128xf32> to vector<8x128xf32>
    %43 = vector.shape_cast %40 : vector<8x128xf32> to vector<1x8x128xf32>
    tpu.vector_store %arg2[%c8, %c0_21, %c0_22], %43 {strides = array<i32>} : memref<9x8x128xf32, #tpu.memory_space<vmem>>, vector<1x8x128xf32>,
    return
  }
  func.func @transform_0(%arg0: i32) -> (i32, i32) {
    %c0_i32 = arith.constant 0 : i32
    %c0_i32_0 = arith.constant 0 : i32
    return %arg0, %c0_i32 : i32, i32
  }
  func.func @transform_1(%arg0: i32) -> (i32, i32, i32) {
    %c0_i32 = arith.constant 0 : i32
    %c0_i32_0 = arith.constant 0 : i32
    %c0_i32_1 = arith.constant 0 : i32
    return %c0_i32, %arg0, %c0_i32_0 : i32, i32, i32
  }
}

</mosaic_0001>

<bundles_post_ra>
// kernel: tpu_custom_call.1
= control target key start
LH: loop header
LB: loop body
LE: loop exit
PB: predicated region body
PF: predicated region fallthrough
CT: control target
= control target key end

     0   :  { %6 = vsyncpa [#allocation3], 0  ;;  %s1811_s0 = inlined_call_operand.hbm [shape: f32[8,128], index: 0, kind: input, shape index: {}]   ;;  %s1812_s1 = inlined_call_operand.hbm [shape: f32[9,8,128], index: 1, kind: output, shape index: {}]  }
   0x1   :  { %7 = vsyncpa [#allocation4], 0  ;;  %s13_s8 = sshll.u32 %s1811_s0, 4  ;;  %s1386_s9 = smov [#allocation2]   ;;  %s14_s8 = int_to_ptr.hbm [resolvable:$true] %s13_s8 }
   0x2   :  { %s15_s10 = sshll.u32 %s1386_s9, 4  ;;  %s16_s10 = int_to_ptr.vmem [resolvable:$true] %s15_s10 }
   0x3   :  { %18 = dma.hbm_to_vmem [thread:$0]  %s14_s8, 128, %s16_s10, [#allocation3]  }
   0x4   :  { %1382 = dma.done.wait [#allocation3], 128  }
   0x5   :  { %1383 = vsyncadd [#allocation3], 4294967168  ;;  %v1410_v0 = vld [vmem:[#allocation2] sm:$0xff]  ;;  %v1387_v25 = vmov 683565275   ;;  %s1394_s0 = smov [#allocation5]  }
   0x6   :  { %24 = vst [vmem:[#allocation5] sm:$0xff] %v1410_v0  ;;  %v25_v1 = vand.u32 2147483647, %v1410_v0  ;;  %v28_v2 = vand.u32 2139095040, %v1410_v0  ;;  %v1416_v3 = vmul.f32 2.0, %v1410_v0  ;;  %v1419_v4 = vmul.f32 4.0, %v1410_v0 }
   0x7   :  { %v1388_v27 = vmov 2475754826   ;;  %v1389_v29 = vmov 2131351028   ;;  %v1390_v31 = vmov 2102212464  }
   0x8   :  { %v29_v5 = vshrl.u32 %v28_v2, 23  ;;  %v32_v6 = vand.u32 8388607, %v25_v1  ;;  %v342_v7 = vand.u32 2139095040, %v1416_v3  ;;  %v339_v8 = vand.u32 2147483647, %v1416_v3 }
   0x9   :  { %v656_v9 = vand.u32 2139095040, %v1419_v4  ;;  %v1391_v33 = vmov 920167782   ;;  %v1392_v42 = vmov 1326507024   ;;  %s1284_s11 = sshll.u32 %s1394_s0, 4  ;;  %s1285_s11 = int_to_ptr.vmem [resolvable:$true] %s1284_s11 }
   0xa   :  { %v1299_v10 = vadd.s32 4294967169, %v29_v5  ;;  %v343_v11 = vshrl.u32 %v342_v7, 23  ;;  %v33_v12 = vor.u32 8388608, %v32_v6  ;;  %v346_v15 = vand.u32 8388607, %v339_v8  ;;  %s1286_s14 = sshll.u32 %s1812_s1, 4  ;;  %s1287_s14 = int_to_ptr.hbm [resolvable:$true] %s1286_s14 }
   0xb   :  { %v657_v16 = vshrl.u32 %v656_v9, 23  ;;  %s1395_s15 = smov 128   ;;  %s1396_s16 = smov 8  }
   0xc   :  { %v35_v13 = vadd.s32 1, %v1299_v10  ;;  %v1305_v14 = vadd.s32 4294967169, %v343_v11  ;;  %v1428_v19 = vshll.u32 %v33_v12, 8  ;;  %v347_v22 = vor.u32 8388608, %v346_v15 }
   0xd   :  { %v1430_v23 = vadd.s32 4294967169, %v657_v16 }
   0xe   :  { %vm36_vm0 = vcmp.gt.s32.totalorder %v35_v13, 0  ;;  %v349_v17 = vadd.s32 1, %v1305_v14  ;;  %v74_v35 = vand.u32 65535, %v1428_v19  ;;  %v75_v60 = vshrl.u32 %v1428_v19, 16 }
   0xf   :  { %v37_v18 = vsel %vm36_vm0, %v35_v13, 0  ;;  %v1451_v61 = vshll.u32 %v347_v22, 8 }
  0x10   :  { %v39_v20 = vand.u32 31, %v37_v18  ;;  %vm350_vm1 = vcmp.gt.s32.totalorder %v349_v17, 0  ;;  %v38_v21 = vshrl.u32 %v37_v18, 5 }
  0x11   :  { %v351_v36 = vsel %vm350_vm1, %v349_v17, 0 }
  0x12   :  { %v40_v24 = vsub.s32 32, %v39_v20  ;;  %v42_v26 = vshll.u32 %v1387_v25, %v39_v20  ;;  %v45_v28 = vshll.u32 %v1388_v27, %v39_v20  ;;  %v48_v30 = vshll.u32 %v1389_v29, %v39_v20 }
  0x13   :  { %v51_v32 = vshll.u32 %v1390_v31, %v39_v20  ;;  %v54_v34 = vshll.u32 %v1391_v33, %v39_v20  ;;  %vm57_vm2 = vcmp.lt.s32.totalorder %v38_v21, 1  ;;  %vm58_vm3 = vcmp.lt.s32.totalorder %v38_v21, 2 }
  0x14   :  { %v41_v37 = vshrl.u32 %v1387_v25, %v40_v24  ;;  %v43_v38 = vshrl.u32 %v1388_v27, %v40_v24  ;;  %v46_v39 = vshrl.u32 %v1389_v29, %v40_v24  ;;  %v49_v40 = vshrl.u32 %v1390_v31, %v40_v24 }
  0x15   :  { %v52_v41 = vshrl.u32 %v1391_v33, %v40_v24  ;;  %v55_v43 = vshrl.u32 %v1392_v42, %v40_v24  ;;  %vm60_vm4 = vcmp.lt.s32.totalorder %v38_v21, 4  ;;  %vm59_vm5 = vcmp.lt.s32.totalorder %v38_v21, 3 }
  0x16   :  { %v44_v44 = vor.u32 %v43_v38, %v42_v26  ;;  %v47_v45 = vor.u32 %v46_v39, %v45_v28  ;;  %v50_v46 = vor.u32 %v49_v40, %v48_v30  ;;  %v1445_v49 = vand.u32 31, %v351_v36 }
  0x17   :  { %v53_v47 = vor.u32 %v52_v41, %v51_v32  ;;  %v56_v48 = vor.u32 %v55_v43, %v54_v34  ;;  %v1458_v5 = vshrl.u32 %v351_v36, 5  ;;  %v1393_v43 = vmov 0  }
  0x18   :  { %v61_v50 = vsel %vm57_vm2, %v41_v37, %v44_v44  ;;  %v62_v51 = vsel %vm60_vm4, %v50_v46, 2102212464  ;;  %v65_v52 = vsel %vm57_vm2, %v44_v44, %v47_v45  ;;  %v69_v53 = vsel %vm57_vm2, %v47_v45, %v50_v46 }
  0x19   :  { %v63_v54 = vsel %vm59_vm5, %v47_v45, %v62_v51  ;;  %v66_v55 = vsel %vm60_vm4, %v53_v47, 920167782  ;;  %v70_v56 = vsel %vm60_vm4, %v56_v48, 1326507024  ;;  %v1448_v57 = vsub.s32 32, %v1445_v49 }
  0x1a   :  { %v67_v58 = vsel %vm59_vm5, %v50_v46, %v66_v55  ;;  %v71_v59 = vsel %vm59_vm5, %v53_v47, %v70_v56  ;;  %v1454_v62 = vsel %vm58_vm3, %v61_v50, %v63_v54  ;;  %v356_v11 = vshll.u32 %v1387_v25, %v1445_v49 }
  0x1b   :  { %v68_v63 = vsel %vm58_vm3, %v65_v52, %v67_v58  ;;  %v72_v2 = vsel %vm58_vm3, %v69_v53, %v71_v59  ;;  %v357_v12 = vshrl.u32 %v1388_v27, %v1448_v57  ;;  %v359_v13 = vshll.u32 %v1388_v27, %v1445_v49 }
  0x1c   :  { %v76_v6 = vand.u32 65535, %v72_v2  ;;  %v77_v7 = vshrl.u32 %v72_v2, 16  ;;  %v98_v9 = vand.u32 65535, %v68_v63  ;;  %v99_v10 = vshrl.u32 %v68_v63, 16 }
  0x1d   :  { %v360_v14 = vshrl.u32 %v1389_v29, %v1448_v57  ;;  %v362_v18 = vshll.u32 %v1389_v29, %v1445_v49  ;;  %v1470_v41 = vor.u32 %v357_v12, %v356_v11  ;;  %v365_v48 = vshll.u32 %v1390_v31, %v1445_v49 }
  0x1e   :  { %v78_v15 = vmul.u32 %v76_v6, %v74_v35  ;;  %v79_v16 = vmul.u32 %v77_v7, %v74_v35  ;;  %v80_v17 = vmul.u32 %v76_v6, %v75_v60  ;;  %v81_v20 = vmul.u32 %v77_v7, %v75_v60 }
  0x1f   :  { %v100_v21 = vmul.u32 %v98_v9, %v74_v35  ;;  %v101_v22 = vmul.u32 %v99_v10, %v74_v35  ;;  %v102_v24 = vmul.u32 %v98_v9, %v75_v60  ;;  %v103_v32 = vmul.u32 %v99_v10, %v75_v60 }
  0x20   :  { %v82_v26 = vshll.u32 %v79_v16, 16  ;;  %v83_v28 = vshrl.u32 %v79_v16, 16  ;;  %v84_v30 = vshll.u32 %v80_v17, 16  ;;  %v85_v34 = vshrl.u32 %v80_v17, 16 }
  0x21   :  { %v104_v36 = vshll.u32 %v101_v22, 16  ;;  %v105_v37 = vshrl.u32 %v101_v22, 16  ;;  %v106_v38 = vshll.u32 %v102_v24, 16  ;;  %v107_v40 = vshrl.u32 %v102_v24, 16 }
  0x22   :  { %vm86_vm6 = vc.u32 %v78_v15, %v82_v26  ;;  %v88_v39 = vadd.s32 %v82_v26, %v78_v15  ;;  %v363_v35 = vshrl.u32 %v1390_v31, %v1448_v57  ;;  %v361_v52 = vor.u32 %v360_v14, %v359_v13 }
  0x23   :  { %v87_v44 = vsel %vm86_vm6, 1, %v1393_v43  ;;  %vm108_vm7 = vc.u32 %v100_v21, %v104_v36  ;;  %v110_v45 = vadd.s32 %v104_v36, %v100_v21  ;;  %v366_v56 = vshrl.u32 %v1391_v33, %v1448_v57 }
  0x24   :  { %v89_v46 = vadd.s32 %v87_v44, %v81_v20  ;;  %vm90_vm8 = vc.u32 %v88_v39, %v84_v30  ;;  %v109_v47 = vsel %vm108_vm7, 1, %v1393_v43  ;;  %v364_v55 = vor.u32 %v363_v35, %v362_v18 }
  0x25   :  { %v91_v50 = vsel %vm90_vm8, 1, %v1393_v43  ;;  %v111_v51 = vadd.s32 %v109_v47, %v103_v32  ;;  %vm112_vm9 = vc.u32 %v110_v45, %v106_v38  ;;  %v368_v59 = vshll.u32 %v1391_v33, %v1445_v49 }
  0x26   :  { %v93_v53 = vadd.s32 %v91_v50, %v89_v46  ;;  %v113_v54 = vsel %vm112_vm9, 1, %v1393_v43  ;;  %v369_v60 = vshrl.u32 %v1392_v42, %v1448_v57  ;;  %vm371_vm10 = vcmp.lt.s32.totalorder %v1458_v5, 1 }
  0x27   :  { %v115_v58 = vadd.s32 %v113_v54, %v111_v51  ;;  %v1487_v2 = vadd.s32 %v110_v45, %v106_v38  ;;  %v367_v6 = vor.u32 %v366_v56, %v365_v48  ;;  %vm373_vm11 = vcmp.lt.s32.totalorder %v1458_v5, 3 }
  0x28   :  { %v94_v63 = vadd.s32 %v93_v53, %v83_v28  ;;  %v370_v9 = vor.u32 %v369_v60, %v368_v59  ;;  %vm372_vm12 = vcmp.lt.s32.totalorder %v1458_v5, 2  ;;  %vm374_vm13 = vcmp.lt.s32.totalorder %v1458_v5, 4 }
  0x29   :  { %v116_v7 = vadd.s32 %v115_v58, %v105_v37  ;;  %v379_v49 = vsel %vm371_vm10, %v1470_v41, %v361_v52  ;;  %v380_v11 = vsel %vm374_vm13, %v367_v6, 920167782  ;;  %v663_v12 = vadd.s32 1, %v1430_v23 }
  0x2a   :  { %v1492_v10 = vadd.s32 %v94_v63, %v85_v34  ;;  %v381_v14 = vsel %vm373_vm11, %v364_v55, %v380_v11  ;;  %v388_v15 = vand.u32 65535, %v1451_v61  ;;  %v389_v16 = vshrl.u32 %v1451_v61, 16 }
  0x2b   :  { %v117_v13 = vadd.s32 %v116_v7, %v107_v40  ;;  %v118_v17 = vmul.u32 %v1428_v19, %v1454_v62  ;;  %v382_v18 = vsel %vm372_vm12, %v379_v49, %v381_v14  ;;  %v383_v23 = vsel %vm371_vm10, %v361_v52, %v364_v55 }
  0x2c   :  { %vm120_vm14 = vc.u32 %v1492_v10, %v1487_v2  ;;  %v384_v21 = vsel %vm374_vm13, %v370_v9, 1326507024  ;;  %v412_v22 = vand.u32 65535, %v382_v18  ;;  %v413_v24 = vshrl.u32 %v382_v18, 16 }
  0x2d   :  { %v121_v20 = vadd.s32 1, %v117_v13  ;;  %v355_v26 = vshrl.u32 %v1387_v25, %v1448_v57  ;;  %v385_v19 = vsel %vm373_vm11, %v367_v6, %v384_v21  ;;  %vm664_vm15 = vcmp.gt.s32.totalorder %v663_v12, 0 }
  0x2e   :  { %v386_v28 = vsel %vm372_vm12, %v383_v23, %v385_v19  ;;  %v414_v30 = vmul.u32 %v412_v22, %v388_v15  ;;  %v415_v32 = vmul.u32 %v413_v24, %v388_v15  ;;  %v416_v38 = vmul.u32 %v412_v22, %v389_v16 }
  0x2f   :  { %v122_v62 = vsel %vm120_vm14, %v121_v20, %v117_v13  ;;  %v390_v36 = vand.u32 65535, %v386_v28  ;;  %v391_v37 = vshrl.u32 %v386_v28, 16  ;;  %v1520_v40 = vsel %vm664_vm15, %v663_v12, 0 }
  0x30   :  { %v123_v34 = vadd.s32 %v122_v62, %v118_v17  ;;  %v418_v39 = vshll.u32 %v415_v32, 16  ;;  %v376_v57 = vsel %vm374_vm13, %v364_v55, 2102212464  ;;  %v375_v46 = vsel %vm371_vm10, %v355_v26, %v1470_v41 }
  0x31   :  { %v392_v45 = vmul.u32 %v390_v36, %v388_v15  ;;  %v393_v35 = vmul.u32 %v391_v37, %v388_v15  ;;  %v394_v47 = vmul.u32 %v390_v36, %v389_v16  ;;  %v417_v48 = vmul.u32 %v413_v24, %v389_v16 }
  0x32   :  { %v124_v44 = vadd.s32 536870912, %v123_v34  ;;  %v420_v50 = vshll.u32 %v416_v38, 16  ;;  %v395_v53 = vmul.u32 %v391_v37, %v389_v16  ;;  %vm422_vm0 = vc.u32 %v414_v30, %v418_v39 }
  0x33   :  { %v396_v54 = vshll.u32 %v393_v35, 16  ;;  %v377_v56 = vsel %vm373_vm11, %v361_v52, %v376_v57  ;;  %v398_v58 = vshll.u32 %v394_v47, 16  ;;  %v423_v59 = vsel %vm422_vm0, 1, %v1393_v43 }
  0x34   :  { %v125_v51 = vshrl.u32 %v124_v44, 30  ;;  %v424_v55 = vadd.s32 %v418_v39, %v414_v30  ;;  %v667_v6 = vand.u32 31, %v1520_v40  ;;  %v419_v7 = vshrl.u32 %v415_v32, 16 }
  0x35   :  { %vm400_vm1 = vc.u32 %v392_v45, %v396_v54  ;;  %v402_v63 = vadd.s32 %v396_v54, %v392_v45  ;;  %v425_v9 = vadd.s32 %v423_v59, %v417_v48  ;;  %v397_v11 = vshrl.u32 %v393_v35, 16 }
  0x36   :  { %v126_v60 = vshll.u32 %v125_v51, 30  ;;  %v401_v41 = vsel %vm400_vm1, 1, %v1393_v43  ;;  %vm426_vm2 = vc.u32 %v424_v55, %v420_v50  ;;  %v399_v13 = vshrl.u32 %v394_v47, 16 }
  0x37   :  { %v403_v12 = vadd.s32 %v401_v41, %v395_v53  ;;  %vm404_vm3 = vc.u32 %v402_v63, %v398_v58  ;;  %v421_v14 = vshrl.u32 %v416_v38, 16  ;;  %v427_v15 = vsel %vm426_vm2, 1, %v1393_v43 }
  0x38   :  { %v127_v49 = vsub.s32 %v123_v34, %v126_v60  ;;  %v405_v52 = vsel %vm404_vm3, 1, %v1393_v43  ;;  %v429_v18 = vadd.s32 %v427_v15, %v425_v9  ;;  %v378_v23 = vsel %vm372_vm12, %v375_v46, %v377_v56 }
  0x39   :  { %v407_v17 = vadd.s32 %v405_v52, %v403_v12  ;;  %v653_v20 = vand.u32 2147483647, %v1419_v4  ;;  %v1537_v24 = vadd.s32 %v424_v55, %v420_v50  ;;  %v668_v62 = vsub.s32 32, %v667_v6 }
  0x3a   :  { %vm128_vm4 = vcmp.lt.s32.totalorder %v127_v49, 0  ;;  %v129_v16 = vsub.s32 0, %v127_v49  ;;  %v430_v26 = vadd.s32 %v429_v18, %v419_v7  ;;  %vm1541_vm5 = vcmp.le.f32.partialorder %v25_v1, 0.7853982 }
  0x3b   :  { %v408_v22 = vadd.s32 %v407_v17, %v397_v11  ;;  %vm27_vm6 = vcmp.lt.s32.totalorder %v1410_v0, 0  ;;  %v432_v34 = vmul.u32 %v1451_v61, %v378_v23  ;;  %v149_v36 = vsub.s32 4, %v125_v51 }
  0x3c   :  { %v130_v21 = vsel %vm128_vm4, %v129_v16, %v127_v49  ;;  %v431_v30 = vadd.s32 %v430_v26, %v421_v14  ;;  %v660_v38 = vand.u32 8388607, %v653_v20  ;;  %v119_v39 = vadd.s32 %v1487_v2, %v1492_v10 }
  0x3d   :  { %v131_v19 = vclz %v130_v21  ;;  %v409_v28 = vadd.s32 %v408_v22, %v399_v13  ;;  %v673_v1 = vshll.u32 %v1388_v27, %v667_v6  ;;  %v674_v44 = vshrl.u32 %v1389_v29, %v668_v62 }
  0x3e   :  { %v435_v37 = vadd.s32 1, %v431_v30  ;;  %v676_v35 = vshll.u32 %v1389_v29, %v667_v6  ;;  %v677_v61 = vshrl.u32 %v1390_v31, %v668_v62  ;;  %v150_v53 = vsel %vm27_vm6, %v149_v36, %v125_v51 }
  0x3f   :  { %v1300_v5 = vadd.s32 4294967294, %v131_v19  ;;  %vm434_vm7 = vc.u32 %v409_v28, %v1537_v24  ;;  %v1559_v2 = vshrl.u32 %v1520_v40, 5  ;;  %v682_v10 = vshll.u32 %v1391_v33, %v667_v6 }
  0x40   :  { %v436_v45 = vsel %vm434_vm7, %v435_v37, %v431_v30  ;;  %v683_v54 = vshrl.u32 %v1392_v42, %v668_v62  ;;  %v679_v59 = vshll.u32 %v1390_v31, %v667_v6  ;;  %v680_v55 = vshrl.u32 %v1391_v33, %v668_v62 }
  0x41   :  { %vm1301_vm8 = vcmp.lt.s32.totalorder %v1300_v5, 0  ;;  %v437_v50 = vadd.s32 %v436_v45, %v432_v34  ;;  %v661_v63 = vor.u32 8388608, %v660_v38  ;;  %v670_v41 = vshll.u32 %v1387_v25, %v667_v6 }
  0x42   :  { %v134_v57 = vsel %vm1301_vm8, 0, %v1300_v5  ;;  %v671_v7 = vshrl.u32 %v1388_v27, %v668_v62  ;;  %v675_v40 = vor.u32 %v674_v44, %v673_v1  ;;  %v152_v11 = vsel %vm1541_vm5, 0, %v150_v53 }
  0x43   :  { %v135_v46 = vsub.s32 32, %v134_v57  ;;  %v136_v47 = vshll.u32 %v127_v49, %v134_v57  ;;  %v139_v48 = vsub.s32 4294967266, %v134_v57  ;;  %v438_v60 = vadd.s32 536870912, %v437_v50 }
  0x44   :  { %v678_v49 = vor.u32 %v677_v61, %v676_v35  ;;  %v684_v13 = vor.u32 %v683_v54, %v682_v10  ;;  %vm685_vm9 = vcmp.lt.s32.totalorder %v1559_v2, 1  ;;  %v681_v15 = vor.u32 %v680_v55, %v679_v59 }
  0x45   :  { %v137_v56 = vshrl.u32 %v119_v39, %v135_v46  ;;  %v140_v58 = vadd.s32 127, %v139_v48  ;;  %v1569_v12 = vshrl.u32 %v438_v60, 30  ;;  %vm688_vm10 = vcmp.lt.s32.totalorder %v1559_v2, 4 }
  0x46   :  { %vm687_vm11 = vcmp.lt.s32.totalorder %v1559_v2, 3  ;;  %v672_v17 = vor.u32 %v671_v7, %v670_v41  ;;  %vm686_vm12 = vcmp.lt.s32.totalorder %v1559_v2, 2  ;;  %v697_v18 = vsel %vm685_vm9, %v675_v40, %v678_v49 }
  0x47   :  { %v138_v51 = vor.u32 %v137_v56, %v136_v47  ;;  %v141_v9 = vshll.u32 %v140_v58, 23  ;;  %v440_v6 = vshll.u32 %v1569_v12, 30  ;;  %v169_v23 = vadd.s32 3, %v152_v11 }
  0x48   :  { %v669_v22 = vshrl.u32 %v1387_v25, %v668_v62  ;;  %v698_v26 = vsel %vm688_vm10, %v684_v13, 1326507024  ;;  %v694_v30 = vsel %vm688_vm10, %v681_v15, 920167782  ;;  %v1587_v34 = vshll.u32 %v661_v63, 8 }
  0x49   :  { %v142_v52 = vor.u32 4788187, %v141_v9  ;;  %v145_v14 = vcvt.s32.f32 %v138_v51  ;;  %v1578_v21 = vsub.s32 %v437_v50, %v440_v6  ;;  %v699_v5 = vsel %vm687_vm11, %v681_v15, %v698_v26 }
  0x4a   :  { %v433_v36 = vadd.s32 %v1537_v24, %v409_v28  ;;  %v700_v62 = vsel %vm686_vm12, %v697_v18, %v699_v5  ;;  %v693_v39 = vsel %vm685_vm9, %v672_v17, %v675_v40  ;;  %v702_v1 = vand.u32 65535, %v1587_v34 }
  0x4b   :  { %v143_v16 = vand.u32 2147483647, %v142_v52  ;;  %vm442_vm13 = vcmp.lt.s32.totalorder %v1578_v21, 0  ;;  %v443_v37 = vsub.s32 0, %v1578_v21  ;;  %v704_v44 = vand.u32 65535, %v700_v62 }
  0x4c   :  { %v695_v45 = vsel %vm687_vm11, %v678_v49, %v694_v30  ;;  %v1601_v24 = vshrl.u32 %v1587_v34, 16  ;;  %v705_v28 = vshrl.u32 %v700_v62, 16  ;;  %v1605_v61 = vand.u32 3, %v169_v23 }
  0x4d   :  { %v146_v19 = vmul.f32 %v145_v14, %v143_v16  ;;  %v444_v57 = vsel %vm442_vm13, %v443_v37, %v1578_v21  ;;  %vm341_vm14 = vcmp.lt.s32.totalorder %v1416_v3, 0  ;;  %v690_v47 = vsel %vm688_vm10, %v678_v49, 2102212464 }
  0x4e   :  { %v445_v46 = vclz %v444_v57  ;;  %v1615_v50 = vand.u32 3, %v152_v11  ;;  %v706_v53 = vmul.u32 %v704_v44, %v702_v1  ;;  %v1617_v10 = vmul.u32 %v705_v28, %v702_v1 }
  0x4f   :  { %v147_v38 = vxor.u32 2147483648, %v146_v19  ;;  %v689_v58 = vsel %vm685_vm9, %v669_v22, %v672_v17  ;;  %v696_v59 = vsel %vm686_vm12, %v693_v39, %v695_v45  ;;  %v463_v55 = vsub.s32 4, %v1569_v12 }
  0x50   :  { %v1306_v56 = vadd.s32 4294967294, %v445_v46  ;;  %v691_v32 = vsel %vm687_vm11, %v675_v40, %v690_v47  ;;  %v1629_v60 = vmul.u32 %v704_v44, %v1601_v24  ;;  %v710_v63 = vshll.u32 %v1617_v10, 16 }
  0x51   :  { %v148_v35 = vsel %vm27_vm6, %v147_v38, %v146_v19  ;;  %v726_v51 = vand.u32 65535, %v696_v59  ;;  %vm1634_vm0 = vcmp.le.f32.partialorder %v339_v8, 0.7853982  ;;  %v709_v11 = vmul.u32 %v705_v28, %v1601_v24 }
  0x52   :  { %v1613_v48 = vsel %vm1541_vm5, %v1410_v0, %v148_v35  ;;  %vm1307_vm15 = vcmp.lt.s32.totalorder %v1306_v56, 0  ;;  %vm714_vm1 = vc.u32 %v706_v53, %v710_v63  ;;  %v727_v40 = vshrl.u32 %v696_v59, 16 }
  0x53   :  { %v153_v54 = vmul.f32 %v1613_v48, %v1613_v48  ;;  %v448_v49 = vsel %vm1307_vm15, 0, %v1306_v56  ;;  %vm175_vm2 = vcmp.eq.s32.totalorder %v1605_v61, 2  ;;  %vm331_vm3 = vcmp.eq.s32.totalorder %v1615_v50, 2 }
  0x54   :  { %v449_v14 = vsub.s32 32, %v448_v49  ;;  %v450_v15 = vshll.u32 %v1578_v21, %v448_v49  ;;  %v453_v6 = vsub.s32 4294967266, %v448_v49  ;;  %v712_v8 = vshll.u32 %v1629_v60, 16 }
  0x55   :  { %v154_v41 = vmul.f32 -0.001358992, %v153_v54  ;;  %v161_v7 = vmul.f32 -0.00019511016, %v153_v54  ;;  %v715_v16 = vsel %vm714_vm1, 1, %v1393_v43  ;;  %v716_v17 = vadd.s32 %v710_v63, %v706_v53 }
  0x56   :  { %v451_v22 = vshrl.u32 %v433_v36, %v449_v14  ;;  %v1646_v26 = vsel %vm686_vm12, %v689_v58, %v691_v32  ;;  %vm172_vm4 = vcmp.eq.s32.totalorder %v1605_v61, 0  ;;  %vm328_vm5 = vcmp.eq.s32.totalorder %v1615_v50, 0 }
  0x57   :  { %v155_v13 = vadd.f32 0.041655596, %v154_v41  ;;  %v162_v52 = vadd.f32 0.008332121, %v161_v7  ;;  %v454_v21 = vadd.s32 127, %v453_v6  ;;  %v464_v19 = vsel %vm341_vm14, %v463_v55, %v1569_v12 }
  0x58   :  { %v717_v30 = vadd.s32 %v715_v16, %v709_v11  ;;  %v729_v5 = vmul.u32 %v727_v40, %v702_v1  ;;  %vm171_vm6 = vcmp.lt.s32.totalorder %v1605_v61, 2  ;;  %vm327_vm7 = vcmp.lt.s32.totalorder %v1615_v50, 2 }
  0x59   :  { %v156_v18 = vmul.f32 %v155_v13, %v153_v54  ;;  %v163_v23 = vmul.f32 %v162_v52, %v153_v54  ;;  %v452_v2 = vor.u32 %v451_v22, %v450_v15  ;;  %v730_v36 = vmul.u32 %v726_v51, %v1601_v24 }
  0x5a   :  { %vm168_vm8 = vweird.f32 %v1410_v0  ;;  %v455_v38 = vshll.u32 %v454_v21, 23  ;;  %v711_v39 = vshrl.u32 %v1617_v10, 16  ;;  %vm718_vm9 = vc.u32 %v716_v17, %v712_v8 }
  0x5b   :  { %v157_v37 = vadd.f32 -0.4999988, %v156_v18  ;;  %v164_v62 = vadd.f32 -0.16666654, %v163_v23  ;;  %v728_v44 = vmul.u32 %v726_v51, %v702_v1  ;;  %v459_v45 = vcvt.s32.f32 %v452_v2 }
  0x5c   :  { %v719_v28 = vsel %vm718_vm9, 1, %v1393_v43  ;;  %v456_v35 = vor.u32 4788187, %v455_v38  ;;  %v731_v47 = vmul.u32 %v727_v40, %v1601_v24  ;;  %v732_v53 = vshll.u32 %v729_v5, 16 }
  0x5d   :  { %v158_v57 = vmul.f32 %v157_v37, %v153_v54  ;;  %v165_v12 = vmul.f32 %v164_v62, %v153_v54  ;;  %v721_v46 = vadd.s32 %v719_v28, %v717_v30  ;;  %v466_v59 = vsel %vm1634_vm0, 0, %v464_v19 }
  0x5e   :  { %v734_v55 = vshll.u32 %v730_v36, 16  ;;  %v457_v32 = vand.u32 2147483647, %v456_v35  ;;  %v713_v10 = vshrl.u32 %v1629_v60, 16  ;;  %vm736_vm10 = vc.u32 %v728_v44, %v732_v53 }
  0x5f   :  { %v159_v56 = vadd.f32 1.0, %v158_v57  ;;  %v166_v58 = vadd.f32 1.0, %v165_v12  ;;  %v722_v1 = vadd.s32 %v721_v46, %v711_v39  ;;  %v737_v41 = vsel %vm736_vm10, 1, %v1393_v43 }
  0x60   :  { %v738_v7 = vadd.s32 %v732_v53, %v728_v44  ;;  %v460_v51 = vmul.f32 %v459_v45, %v457_v32  ;;  %v733_v24 = vshrl.u32 %v729_v5, 16  ;;  %v739_v49 = vadd.s32 %v737_v41, %v731_v47 }
  0x61   :  { %v167_v54 = vmul.f32 %v166_v58, %v1613_v48  ;;  %v176_v63 = vxor.u32 2147483648, %v159_v56  ;;  %v1666_v11 = vmul.f32 8.0, %v1410_v0  ;;  %v1672_v48 = vadd.s32 %v722_v1, %v713_v10 }
  0x62   :  { %vm740_vm11 = vc.u32 %v738_v7, %v734_v55  ;;  %v461_v52 = vxor.u32 2147483648, %v460_v51  ;;  %v735_v14 = vshrl.u32 %v730_v36, 16  ;;  %v1686_v21 = vadd.s32 %v738_v7, %v734_v55 }
  0x63   :  { %v173_v40 = vxor.u32 2147483648, %v167_v54  ;;  %v177_v13 = vsel %vm175_vm2, %v176_v63, %v167_v54  ;;  %v333_v60 = vsel %vm331_vm3, %v176_v63, %v167_v54  ;;  %v741_v15 = vsel %vm740_vm11, 1, %v1393_v43 }
  0x64   :  { %v743_v16 = vadd.s32 %v741_v15, %v739_v49  ;;  %v970_v17 = vand.u32 2139095040, %v1666_v11  ;;  %v462_v22 = vsel %vm341_vm14, %v461_v52, %v460_v51  ;;  %v483_v50 = vadd.s32 3, %v466_v59 }
  0x65   :  { %v174_v6 = vsel %vm172_vm4, %v159_v56, %v173_v40  ;;  %v330_v8 = vsel %vm328_vm5, %v159_v56, %v173_v40  ;;  %v465_v5 = vsel %vm1634_vm0, %v1416_v3, %v462_v22  ;;  %v746_v36 = vmul.u32 %v1587_v34, %v1646_v26 }
  0x66   :  { %v178_v18 = vsel %vm171_vm6, %v174_v6, %v177_v13  ;;  %v334_v23 = vsel %vm327_vm7, %v330_v8, %v333_v60  ;;  %v744_v61 = vadd.s32 %v743_v16, %v733_v24  ;;  %v467_v37 = vmul.f32 %v465_v5, %v465_v5 }
  0x67   :  { %v179_v19 = vsel %vm168_vm8, nan, %v178_v18  ;;  %v335_v30 = vsel %vm168_vm8, nan, %v334_v23  ;;  %v971_v62 = vshrl.u32 %v970_v17, 23  ;;  %vm748_vm12 = vc.u32 %v1672_v48, %v1686_v21 }
  0x68   :  { %181 = vst [vmem:[#allocation5 + $0x8] sm:$0xff] %v179_v19  ;;  %v745_v2 = vadd.s32 %v744_v61, %v735_v14  ;;  %v468_v38 = vmul.f32 -0.001358992, %v467_v37  ;;  %v475_v39 = vmul.f32 -0.00019511016, %v467_v37  ;;  %v484_v12 = vand.u32 3, %v483_v50 }
  0x69   :  { %337 = vst [vmem:[#allocation5 + $0x10] sm:$0xff] %v335_v30  ;;  %v1317_v0 = vadd.s32 4294967169, %v971_v62  ;;  %v640_v28 = vand.u32 3, %v466_v59  ;;  %v967_v46 = vand.u32 2147483647, %v1666_v11  ;;  %vm482_vm15 = vweird.f32 %v1416_v3 }
  0x6a   :  { %v749_v44 = vadd.s32 1, %v745_v2  ;;  %v469_v57 = vadd.f32 0.041655596, %v468_v38  ;;  %v476_v9 = vadd.f32 0.008332121, %v475_v39  ;;  %vm485_vm14 = vcmp.lt.s32.totalorder %v484_v12, 2 }
  0x6b   :  { %v977_v45 = vadd.s32 1, %v1317_v0  ;;  %vm486_vm0 = vcmp.eq.s32.totalorder %v484_v12, 0  ;;  %vm489_vm1 = vcmp.eq.s32.totalorder %v484_v12, 2  ;;  %vm641_vm2 = vcmp.lt.s32.totalorder %v640_v28, 2 }
  0x6c   :  { %v750_v35 = vsel %vm748_vm12, %v749_v44, %v745_v2  ;;  %v470_v47 = vmul.f32 %v469_v57, %v467_v37  ;;  %v477_v53 = vmul.f32 %v476_v9, %v467_v37  ;;  %v974_v54 = vand.u32 8388607, %v967_v46 }
  0x6d   :  { %v751_v56 = vadd.s32 %v750_v35, %v746_v36  ;;  %vm978_vm13 = vcmp.gt.s32.totalorder %v977_v45, 0  ;;  %vm642_vm3 = vcmp.eq.s32.totalorder %v640_v28, 0  ;;  %vm645_vm4 = vcmp.eq.s32.totalorder %v640_v28, 2 }
  0x6e   :  { %v979_v34 = vsel %vm978_vm13, %v977_v45, 0  ;;  %v471_v26 = vadd.f32 -0.4999988, %v470_v47  ;;  %v478_v58 = vadd.f32 -0.16666654, %v477_v53  ;;  %v975_v16 = vor.u32 8388608, %v974_v54 }
  0x6f   :  { %v752_v55 = vadd.s32 536870912, %v751_v56  ;;  %v981_v32 = vand.u32 31, %v979_v34  ;;  %v1705_v63 = vshrl.u32 %v979_v34, 5  ;;  %v747_v45 = vadd.s32 %v1686_v21, %v1672_v48 }
  0x70   :  { %v472_v10 = vmul.f32 %v471_v26, %v467_v37  ;;  %v479_v59 = vmul.f32 %v478_v58, %v467_v37  ;;  %v1749_v12 = vshll.u32 %v975_v16, 8  ;;  %vm1770_vm11 = vcmp.le.f32.partialorder %v653_v20, 0.7853982 }
  0x71   :  { %v1701_v1 = vshrl.u32 %v752_v55, 30  ;;  %v1707_v41 = vsub.s32 32, %v981_v32  ;;  %v984_v7 = vshll.u32 %v1387_v25, %v981_v32  ;;  %v987_v51 = vshll.u32 %v1388_v27, %v981_v32 }
  0x72   :  { %v473_v24 = vadd.f32 1.0, %v472_v10  ;;  %v480_v49 = vadd.f32 1.0, %v479_v59  ;;  %v990_v52 = vshll.u32 %v1389_v29, %v981_v32  ;;  %vm999_vm5 = vcmp.lt.s32.totalorder %v1705_v63, 1 }
  0x73   :  { %v754_v40 = vshll.u32 %v1701_v1, 30  ;;  %v985_v13 = vshrl.u32 %v1388_v27, %v1707_v41  ;;  %v988_v60 = vshrl.u32 %v1389_v29, %v1707_v41  ;;  %v991_v8 = vshrl.u32 %v1390_v31, %v1707_v41 }
  0x74   :  { %v481_v14 = vmul.f32 %v480_v49, %v465_v5  ;;  %v490_v15 = vxor.u32 2147483648, %v473_v24  ;;  %v993_v29 = vshll.u32 %v1390_v31, %v981_v32  ;;  %v994_v30 = vshrl.u32 %v1391_v33, %v1707_v41 }
  0x75   :  { %v755_v6 = vsub.s32 %v751_v56, %v754_v40  ;;  %v1719_v17 = vor.u32 %v985_v13, %v984_v7  ;;  %v1721_v18 = vor.u32 %v988_v60, %v987_v51  ;;  %v996_v5 = vshll.u32 %v1391_v33, %v981_v32 }
  0x76   :  { %v487_v23 = vxor.u32 2147483648, %v481_v14  ;;  %v491_v27 = vsel %vm489_vm1, %v490_v15, %v481_v14  ;;  %v647_v22 = vsel %vm645_vm4, %v490_v15, %v481_v14  ;;  %v992_v50 = vor.u32 %v991_v8, %v990_v52 }
  0x77   :  { %vm756_vm6 = vcmp.lt.s32.totalorder %v755_v6, 0  ;;  %v757_v19 = vsub.s32 0, %v755_v6  ;;  %v997_v62 = vshrl.u32 %v1392_v42, %v1707_v41  ;;  %v995_v39 = vor.u32 %v994_v30, %v993_v29 }
  0x78   :  { %v488_v61 = vsel %vm486_vm0, %v473_v24, %v487_v23  ;;  %v644_v37 = vsel %vm642_vm3, %v473_v24, %v487_v23  ;;  %vm1001_vm7 = vcmp.lt.s32.totalorder %v1705_v63, 3  ;;  %vm1002_vm8 = vcmp.lt.s32.totalorder %v1705_v63, 4 }
  0x79   :  { %v492_v2 = vsel %vm485_vm14, %v488_v61, %v491_v27  ;;  %v648_v36 = vsel %vm641_vm2, %v644_v37, %v647_v22  ;;  %v758_v38 = vsel %vm756_vm6, %v757_v19, %v755_v6  ;;  %v998_v44 = vor.u32 %v997_v62, %v996_v5 }
  0x7a   :  { %v493_v31 = vsel %vm482_vm15, nan, %v492_v2  ;;  %v649_v33 = vsel %vm482_vm15, nan, %v648_v36  ;;  %v759_v0 = vclz %v758_v38  ;;  %v1008_v57 = vsel %vm1002_vm8, %v995_v39, 920167782 }
  0x7b   :  { %495 = vst [vmem:[#allocation5 + $0x18] sm:$0xff] %v493_v31  ;;  %vm1000_vm9 = vcmp.lt.s32.totalorder %v1705_v63, 2  ;;  %v1011_v9 = vsel %vm999_vm5, %v1721_v18, %v992_v50  ;;  %v1012_v3 = vsel %vm1002_vm8, %v998_v44, 1326507024  ;;  %v1007_v28 = vsel %vm999_vm5, %v1719_v17, %v1721_v18 }
  0x7c   :  { %651 = vst [vmem:[#allocation5 + $0x20] sm:$0xff] %v649_v33  ;;  %v1312_v42 = vadd.s32 4294967294, %v759_v0  ;;  %v1009_v35 = vsel %vm1001_vm7, %v992_v50, %v1008_v57  ;;  %v1013_v53 = vsel %vm1001_vm7, %v995_v39, %v1012_v3  ;;  %v1016_v21 = vand.u32 65535, %v1749_v12 }
  0x7d   :  { %v1014_v58 = vsel %vm1000_vm9, %v1011_v9, %v1013_v53  ;;  %v1010_v48 = vsel %vm1000_vm9, %v1007_v28, %v1009_v35  ;;  %v1017_v55 = vshrl.u32 %v1749_v12, 16  ;;  %v777_v40 = vsub.s32 4, %v1701_v1 }
  0x7e   :  { %vm1313_vm10 = vcmp.lt.s32.totalorder %v1312_v42, 0  ;;  %v1018_v59 = vand.u32 65535, %v1014_v58  ;;  %v1019_v54 = vshrl.u32 %v1014_v58, 16  ;;  %v1040_v24 = vand.u32 65535, %v1010_v48 }
  0x7f   :  { %v762_v47 = vsel %vm1313_vm10, 0, %v1312_v42  ;;  %v1041_v49 = vshrl.u32 %v1010_v48, 16  ;;  %vm655_vm12 = vcmp.lt.s32.totalorder %v1419_v4, 0  ;;  %v983_v8 = vshrl.u32 %v1387_v25, %v1707_v41 }
  0x80   :  { %v763_v56 = vsub.s32 32, %v762_v47  ;;  %v764_v34 = vshll.u32 %v755_v6, %v762_v47  ;;  %v767_v26 = vsub.s32 4294967266, %v762_v47  ;;  %v1020_v13 = vmul.u32 %v1018_v59, %v1016_v21 }
  0x81   :  { %v1021_v60 = vmul.u32 %v1019_v54, %v1016_v21  ;;  %v1022_v52 = vmul.u32 %v1018_v59, %v1017_v55  ;;  %v1023_v16 = vmul.u32 %v1019_v54, %v1017_v55  ;;  %v1042_v19 = vmul.u32 %v1040_v24, %v1016_v21 }
  0x82   :  { %v765_v32 = vshrl.u32 %v747_v45, %v763_v56  ;;  %v768_v10 = vadd.s32 127, %v767_v26  ;;  %v1043_v29 = vmul.u32 %v1041_v49, %v1016_v21  ;;  %v1044_v30 = vmul.u32 %v1040_v24, %v1017_v55 }
  0x83   :  { %v1024_v23 = vshll.u32 %v1021_v60, 16  ;;  %v1026_v27 = vshll.u32 %v1022_v52, 16  ;;  %v778_v20 = vsel %vm655_vm12, %v777_v40, %v1701_v1  ;;  %v1004_v5 = vsel %vm1002_vm8, %v992_v50, 2102212464 }
  0x84   :  { %v766_v7 = vor.u32 %v765_v32, %v764_v34  ;;  %v769_v51 = vshll.u32 %v768_v10, 23  ;;  %v1045_v25 = vmul.u32 %v1041_v49, %v1017_v55  ;;  %v1046_v41 = vshll.u32 %v1043_v29, 16 }
  0x85   :  { %vm1028_vm13 = vc.u32 %v1020_v13, %v1024_v23  ;;  %v1030_v61 = vadd.s32 %v1024_v23, %v1020_v13  ;;  %v1025_v2 = vshrl.u32 %v1021_v60, 16  ;;  %v1048_v38 = vshll.u32 %v1044_v30, 16 }
  0x86   :  { %v770_v15 = vor.u32 4788187, %v769_v51  ;;  %v773_v6 = vcvt.s32.f32 %v766_v7  ;;  %v1029_v62 = vsel %vm1028_vm13, 1, %v1393_v43  ;;  %vm1050_vm15 = vc.u32 %v1042_v19, %v1046_v41 }
  0x87   :  { %v1031_v36 = vadd.s32 %v1029_v62, %v1023_v16  ;;  %vm1032_vm14 = vc.u32 %v1030_v61, %v1026_v27  ;;  %v1052_v33 = vadd.s32 %v1046_v41, %v1042_v19  ;;  %v1003_v1 = vsel %vm999_vm5, %v983_v8, %v1719_v17 }
  0x88   :  { %v771_v22 = vand.u32 2147483647, %v770_v15  ;;  %v1033_v31 = vsel %vm1032_vm14, 1, %v1393_v43  ;;  %v1027_v50 = vshrl.u32 %v1022_v52, 16  ;;  %v1051_v44 = vsel %vm1050_vm15, 1, %v1393_v43 }
  0x89   :  { %v1035_v0 = vadd.s32 %v1033_v31, %v1031_v36  ;;  %v1047_v57 = vshrl.u32 %v1043_v29, 16  ;;  %v1053_v9 = vadd.s32 %v1051_v44, %v1045_v25  ;;  %vm1054_vm0 = vc.u32 %v1052_v33, %v1048_v38 }
  0x8a   :  { %v774_v37 = vmul.f32 %v773_v6, %v771_v22  ;;  %v1005_v45 = vsel %vm1001_vm7, %v1721_v18, %v1004_v5  ;;  %v1055_v17 = vsel %vm1054_vm0, 1, %v1393_v43  ;;  %v1049_v47 = vshrl.u32 %v1044_v30, 16 }
  0x8b   :  { %v1036_v28 = vadd.s32 %v1035_v0, %v1025_v2  ;;  %v1057_v53 = vadd.s32 %v1055_v17, %v1053_v9  ;;  %v780_v56 = vsel %vm1770_vm11, 0, %v778_v20  ;;  %v1056_v26 = vadd.s32 %v1052_v33, %v1048_v38 }
  0x8c   :  { %v775_v39 = vxor.u32 2147483648, %v774_v37  ;;  %v1006_v21 = vsel %vm1000_vm9, %v1003_v1, %v1005_v45  ;;  %v797_v59 = vadd.s32 3, %v780_v56  ;;  %v954_v60 = vand.u32 3, %v780_v56 }
  0x8d   :  { %v1037_v34 = vadd.s32 %v1036_v28, %v1027_v50  ;;  %v1058_v55 = vadd.s32 %v1057_v53, %v1047_v57  ;;  %v1060_v43 = vmul.u32 %v1749_v12, %v1006_v21  ;;  %vm796_vm8 = vweird.f32 %v1419_v4 }
  0x8e   :  { %v776_v42 = vsel %vm655_vm12, %v775_v39, %v774_v37  ;;  %v798_v13 = vand.u32 3, %v797_v59  ;;  %vm959_vm3 = vcmp.eq.s32.totalorder %v954_v60, 2  ;;  %vm956_vm6 = vcmp.eq.s32.totalorder %v954_v60, 0 }
  0x8f   :  { %v779_v3 = vsel %vm1770_vm11, %v1419_v4, %v776_v42  ;;  %v1059_v18 = vadd.s32 %v1058_v55, %v1049_v47  ;;  %vm1062_vm1 = vc.u32 %v1037_v34, %v1056_v26  ;;  %vm955_vm7 = vcmp.lt.s32.totalorder %v954_v60, 2 }
  0x90   :  { %v781_v35 = vmul.f32 %v779_v3, %v779_v3  ;;  %vm803_vm2 = vcmp.eq.s32.totalorder %v798_v13, 2  ;;  %vm799_vm4 = vcmp.lt.s32.totalorder %v798_v13, 2  ;;  %vm800_vm5 = vcmp.eq.s32.totalorder %v798_v13, 0 }
  0x91   :  { %v1063_v51 = vadd.s32 1, %v1059_v18  ;;  %v1061_v39 = vadd.s32 %v1056_v26, %v1037_v34  ;;  %vm969_vm11 = vcmp.lt.s32.totalorder %v1666_v11, 0  ;;  %vm968_vm12 = vcmp.le.f32.partialorder %v967_v46, 0.7853982 }
  0x92   :  { %v782_v58 = vmul.f32 -0.001358992, %v781_v35  ;;  %v789_v48 = vmul.f32 -0.00019511016, %v781_v35 }
  0x93   :  { %v1064_v40 = vsel %vm1062_vm1, %v1063_v51, %v1059_v18 }
  0x94   :  { %v783_v32 = vadd.f32 0.041655596, %v782_v58  ;;  %v790_v10 = vadd.f32 0.008332121, %v789_v48  ;;  %v1065_v52 = vadd.s32 %v1064_v40, %v1060_v43 }
  0x96   :  { %v784_v54 = vmul.f32 %v783_v32, %v781_v35  ;;  %v791_v7 = vmul.f32 %v790_v10, %v781_v35  ;;  %v1066_v15 = vadd.s32 536870912, %v1065_v52 }
  0x98   :  { %v785_v24 = vadd.f32 -0.4999988, %v784_v54  ;;  %v792_v49 = vadd.f32 -0.16666654, %v791_v7  ;;  %v1067_v16 = vshrl.u32 %v1066_v15, 30 }
  0x9a   :  { %v786_v14 = vmul.f32 %v785_v24, %v781_v35  ;;  %v793_v63 = vmul.f32 %v792_v49, %v781_v35  ;;  %v1068_v27 = vshll.u32 %v1067_v16, 30  ;;  %v1091_v28 = vsub.s32 4, %v1067_v16 }
  0x9c   :  { %v787_v6 = vadd.f32 1.0, %v786_v14  ;;  %v794_v8 = vadd.f32 1.0, %v793_v63  ;;  %v1069_v30 = vsub.s32 %v1065_v52, %v1068_v27  ;;  %v1092_v47 = vsel %vm969_vm11, %v1091_v28, %v1067_v16 }
  0x9d   :  { %v1094_v34 = vsel %vm968_vm12, 0, %v1092_v47 }
  0x9e   :  { %v795_v23 = vmul.f32 %v794_v8, %v779_v3  ;;  %v804_v12 = vxor.u32 2147483648, %v787_v6  ;;  %vm1070_vm9 = vcmp.lt.s32.totalorder %v1069_v30, 0  ;;  %v1071_v62 = vsub.s32 0, %v1069_v30 }
  0x9f   :  { %v1111_v55 = vadd.s32 3, %v1094_v34  ;;  %v1268_v54 = vand.u32 3, %v1094_v34 }
  0xa0   :  { %v801_v22 = vxor.u32 2147483648, %v795_v23  ;;  %v805_v19 = vsel %vm803_vm2, %v804_v12, %v795_v23  ;;  %v961_v29 = vsel %vm959_vm3, %v804_v12, %v795_v23  ;;  %v1072_v2 = vsel %vm1070_vm9, %v1071_v62, %v1069_v30 }
  0xa1   :  { %v1073_v36 = vclz %v1072_v2  ;;  %v1112_v43 = vand.u32 3, %v1111_v55  ;;  %vm1273_vm14 = vcmp.eq.s32.totalorder %v1268_v54, 2  ;;  %vm1270_vm1 = vcmp.eq.s32.totalorder %v1268_v54, 0 }
  0xa2   :  { %v802_v20 = vsel %vm800_vm5, %v787_v6, %v801_v22  ;;  %v958_v5 = vsel %vm956_vm6, %v787_v6, %v801_v22  ;;  %vm1269_vm2 = vcmp.lt.s32.totalorder %v1268_v54, 2  ;;  %vm1110_vm3 = vweird.f32 %v1666_v11 }
  0xa3   :  { %v806_v61 = vsel %vm799_vm4, %v802_v20, %v805_v19  ;;  %v962_v37 = vsel %vm955_vm7, %v958_v5, %v961_v29  ;;  %v1318_v38 = vadd.s32 4294967294, %v1073_v36  ;;  %vm1117_vm13 = vcmp.eq.s32.totalorder %v1112_v43, 2 }
  0xa4   :  { %v807_v25 = vsel %vm796_vm8, nan, %v806_v61  ;;  %v963_v41 = vsel %vm796_vm8, nan, %v962_v37  ;;  %vm1113_vm15 = vcmp.lt.s32.totalorder %v1112_v43, 2  ;;  %vm1114_vm0 = vcmp.eq.s32.totalorder %v1112_v43, 0 }
  0xa5   :  { %809 = vst [vmem:[#allocation5 + $0x28] sm:$0xff] %v807_v25  ;;  %vm1319_vm10 = vcmp.lt.s32.totalorder %v1318_v38, 0 }
  0xa6   :  { %965 = vst [vmem:[#allocation5 + $0x30] sm:$0xff] %v963_v41  ;;  %v1076_v31 = vsel %vm1319_vm10, 0, %v1318_v38 }
  0xa7   :  { %v1077_v33 = vsub.s32 32, %v1076_v31  ;;  %v1078_v1 = vshll.u32 %v1069_v30, %v1076_v31  ;;  %v1081_v4 = vsub.s32 4294967266, %v1076_v31 }
  0xa9   :  { %v1079_v50 = vshrl.u32 %v1061_v39, %v1077_v33  ;;  %v1082_v0 = vadd.s32 127, %v1081_v4 }
  0xab   :  { %v1080_v44 = vor.u32 %v1079_v50, %v1078_v1  ;;  %v1083_v42 = vshll.u32 %v1082_v0, 23 }
  0xad   :  { %v1084_v57 = vor.u32 4788187, %v1083_v42  ;;  %v1087_v9 = vcvt.s32.f32 %v1080_v44 }
  0xaf   :  { %v1085_v3 = vand.u32 2147483647, %v1084_v57 }
  0xb1   :  { %v1088_v45 = vmul.f32 %v1087_v9, %v1085_v3 }
  0xb3   :  { %v1089_v17 = vxor.u32 2147483648, %v1088_v45 }
  0xb5   :  { %v1090_v35 = vsel %vm969_vm11, %v1089_v17, %v1088_v45 }
  0xb6   :  { %v1093_v53 = vsel %vm968_vm12, %v1666_v11, %v1090_v35 }
  0xb7   :  { %v1095_v56 = vmul.f32 %v1093_v53, %v1093_v53 }
  0xb9   :  { %v1096_v26 = vmul.f32 -0.001358992, %v1095_v56  ;;  %v1103_v58 = vmul.f32 -0.00019511016, %v1095_v56 }
  0xbb   :  { %v1097_v48 = vadd.f32 0.041655596, %v1096_v26  ;;  %v1104_v21 = vadd.f32 0.008332121, %v1103_v58 }
  0xbd   :  { %v1098_v32 = vmul.f32 %v1097_v48, %v1095_v56  ;;  %v1105_v10 = vmul.f32 %v1104_v21, %v1095_v56 }
  0xbf   :  { %v1099_v18 = vadd.f32 -0.4999988, %v1098_v32  ;;  %v1106_v59 = vadd.f32 -0.16666654, %v1105_v10 }
  0xc1   :  { %v1100_v7 = vmul.f32 %v1099_v18, %v1095_v56  ;;  %v1107_v46 = vmul.f32 %v1106_v59, %v1095_v56 }
  0xc3   :  { %v1101_v51 = vadd.f32 1.0, %v1100_v7  ;;  %v1108_v24 = vadd.f32 1.0, %v1107_v46 }
  0xc5   :  { %v1109_v49 = vmul.f32 %v1108_v24, %v1093_v53  ;;  %v1118_v40 = vxor.u32 2147483648, %v1101_v51 }
  0xc7   :  { %v1115_v13 = vxor.u32 2147483648, %v1109_v49  ;;  %v1119_v60 = vsel %vm1117_vm13, %v1118_v40, %v1109_v49  ;;  %v1275_v52 = vsel %vm1273_vm14, %v1118_v40, %v1109_v49 }
  0xc9   :  { %v1116_v14 = vsel %vm1114_vm0, %v1101_v51, %v1115_v13  ;;  %v1272_v63 = vsel %vm1270_vm1, %v1101_v51, %v1115_v13 }
  0xca   :  { %v1120_v15 = vsel %vm1113_vm15, %v1116_v14, %v1119_v60  ;;  %v1276_v6 = vsel %vm1269_vm2, %v1272_v63, %v1275_v52 }
  0xcb   :  { %v1121_v8 = vsel %vm1110_vm3, nan, %v1120_v15  ;;  %v1277_v16 = vsel %vm1110_vm3, nan, %v1276_v6 }
  0xcc   :  { %1123 = vst [vmem:[#allocation5 + $0x38] sm:$0xff] %v1121_v8 }
  0xcd   :  { %1279 = vst [vmem:[#allocation5 + $0x40] sm:$0xff] %v1277_v16 }
  0xce   :  { %1292 = dma.vmem_to_hbm [thread:$0]  %s1285_s11, 1152, %s1287_s14, [#allocation4], %s1395_s15, %s1395_s15, %s1396_s16  }
  0xcf   :  { %1384 = dma.done.wait [#allocation4], 1152  }
  0xd0   :  { %1385 = vsyncadd [#allocation4], 4294966144 }
  0xd1   :  { %1297 = vsyncpa [#allocation3], 1 }
  0xd2   :  { %1298 = vsyncpa [#allocation4], 1 }

</bundles_post_ra>
